<compile_context>
chip_gen: v7x
topology: tpu7x:2x2x1
jax: 0.10.0
libtpu: 0.0.40
codegen_flags: <defaults>
</compile_context>

<pallas_src>
import numpy as np
import jax
import jax.numpy as jnp
from jax import lax
from jax.experimental import pallas as pl
from jax.experimental.pallas import tpu as pltpu

BN_EPS = 1e-5
LEAKY_SLOPE = 0.2
H1, H2 = 512, 256


def _round_up(x, m):
    return ((x + m - 1) // m) * m


def _vmem_capacity_bytes():
    try:
        return int(pltpu.get_tpu_info().vmem_capacity_bytes)
    except Exception:
        return 64 * 1024 * 1024  # conservative (v7x per-TC) fallback


def _choose_tiles(B, latent, out_dim_pad):
    """Pick (tile_b, tile_n) so the double-buffered working set fits VMEM."""
    cap = _vmem_capacity_bytes()
    budget = min(cap // 4, 24 * 1024 * 1024)  # headroom for pipelining

    def divisors(total, cands):
        return [c for c in cands if c <= total and total % c == 0]

    # tile_b: multiple of 8 (f32 sublane) dividing B, as large as possible
    # (fewer W3 re-streams, better MXU row fill); fall back to full extent.
    tb_cands = divisors(B, (1024, 512, 256, 128, 64, 32, 16, 8)) or [B]
    # tile_n: multiple of 128 dividing the (already 128-padded) out_dim.
    tn_cands = ([out_dim_pad] if out_dim_pad <= 8192 else []) + \
               divisors(out_dim_pad, (8192, 4096, 2048, 1024, 512, 256, 128))
    tn_cands = list(dict.fromkeys(tn_cands)) or [out_dim_pad]

    # Constant-index blocks (double-buffered) + hidden scratch/intermediates.
    const_bytes = 2 * (B * latent * 4 + latent * H1 * 2 + H1 * H2 * 2
                       + 4 * (H1 + H2) * 4)
    hid_bytes = B * H2 * 4 + B * H1 * 4
    fixed = const_bytes + hid_bytes

    def ws_of(tb, tn):
        return fixed + 2 * (H2 * tn * 2 + tn * 4 + tb * tn * 4)

    for tb in tb_cands:          # prefer large tile_b (cuts W3 re-stream B/tb)
        for tn in tn_cands:      # then the largest lane-dense tile_n that fits
            ws = ws_of(tb, tn)
            if ws <= budget:
                return tb, tn, ws, cap
    tb, tn = tb_cands[-1], tn_cands[-1]
    return tb, tn, ws_of(tb, tn), cap


# ---------------------------------------------------------------------------
# Fused kernel
# ---------------------------------------------------------------------------
def _generator_kernel(z_ref, w1_ref, g1_ref, be1_ref, w2_ref, g2_ref, be2_ref,
                      w3_ref, b3_ref, out_ref, hid_ref):
    j = pl.program_id(1)
    tile_b = out_ref.shape[0]

    @pl.when(j == 0)
    def _():
        # Recompute full-batch hidden features once per batch tile (per core).
        # Exact training-mode BN: batch mean, biased variance, folded to a
        # single scale/shift and fused with LeakyReLU.  rsqrt -> EUP slot.
        def bn_leaky(h, gamma, beta):
            mean = jnp.mean(h, axis=0, keepdims=True)
            c = h - mean
            var = jnp.mean(c * c, axis=0, keepdims=True)
            scale = gamma * lax.rsqrt(var + BN_EPS)
            shift = beta - mean * scale
            y = h * scale + shift
            return jnp.where(y > 0, y, LEAKY_SLOPE * y)

        z = z_ref[...].astype(jnp.bfloat16)
        h = jnp.dot(z, w1_ref[...], preferred_element_type=jnp.float32)
        h = bn_leaky(h, g1_ref[...], be1_ref[...])
        h = jnp.dot(h.astype(jnp.bfloat16), w2_ref[...],
                    preferred_element_type=jnp.float32)
        h = bn_leaky(h, g2_ref[...], be2_ref[...])
        hid_ref[...] = h                       # persists across the j loop

    # Main matmul: (tile_b, 256) x (256, tile_n), bf16 operands, f32 acc.
    row0 = pl.multiple_of(pl.program_id(0) * tile_b, tile_b)
    h_tile = hid_ref[pl.ds(row0, tile_b), :].astype(jnp.bfloat16)
    acc = jnp.dot(h_tile, w3_ref[...], preferred_element_type=jnp.float32)
    acc = acc + b3_ref[...]
    out_ref[...] = jnp.tanh(acc).astype(out_ref.dtype)


# ---------------------------------------------------------------------------
# Parameters (shapes mirror the PyTorch module; weights stored (d_in, d_out))
# ---------------------------------------------------------------------------
def make_generator_params(latent_dim, input_shape, key):
    out_dim = int(np.prod(input_shape))
    dims = [(latent_dim, H1), (H1, H2), (H2, out_dim)]
    keys = jax.random.split(key, 2 * len(dims))
    params = {}
    for i, (d_in, d_out) in enumerate(dims):
        bound = 1.0 / np.sqrt(d_in)
        w = jax.random.uniform(keys[2 * i], (d_in, d_out), jnp.float32,
                               -bound, bound)
        b = jax.random.uniform(keys[2 * i + 1], (1, d_out), jnp.float32,
                               -bound, bound)
        params[f"w{i+1}"] = w.astype(jnp.bfloat16)   # bf16 MXU operand
        params[f"b{i+1}"] = b   # b1/b2 kept for parity; cancelled by train-BN.
    params["g1"] = jnp.ones((1, H1), jnp.float32)
    params["be1"] = jnp.zeros((1, H1), jnp.float32)
    params["g2"] = jnp.ones((1, H2), jnp.float32)
    params["be2"] = jnp.zeros((1, H2), jnp.float32)
    return params


# ---------------------------------------------------------------------------
# Forward
# ---------------------------------------------------------------------------
def generator_forward(z, params, input_shape):
    B, latent = z.shape
    out_dim = int(np.prod(input_shape))
    out_dim_pad = _round_up(out_dim, 128)

    w3, b3 = params["w3"], params["b3"]
    if out_dim_pad != out_dim:
        w3 = jnp.pad(w3, ((0, 0), (0, out_dim_pad - out_dim)))
        b3 = jnp.pad(b3, ((0, 0), (0, out_dim_pad - out_dim)))

    tile_b, tile_n, ws, cap = _choose_tiles(B, latent, out_dim_pad)
    n_i, n_j = B // tile_b, out_dim_pad // tile_n
    # TODO(synk): if (B,512) hidden intermediates ever outgrow the VMEM budget,
    # switch the hidden path to a two-pass batch-tiled BN (sum/sumsq per tile).

    def const(shape):
        return pl.BlockSpec(shape, lambda i, j: (0, 0))

    flops = 2 * B * (latent * H1 + H1 * H2) * n_i + 2 * B * H2 * out_dim_pad
    bytes_accessed = (B * latent * 4 + latent * H1 * 2 + H1 * H2 * 2
                      + 4 * (H1 + H2) * 4
                      + n_i * (H2 * out_dim_pad * 2 + out_dim_pad * 4)
                      + B * out_dim_pad * 4)
    transcendentals = B * out_dim_pad + n_i * B * 2
    vmem_limit = int(min(0.75 * cap, max(2 * ws + (8 << 20), 32 << 20)))

    flat = pl.pallas_call(
        _generator_kernel,
        out_shape=jax.ShapeDtypeStruct((B, out_dim_pad), jnp.float32),
        grid=(n_i, n_j),
        in_specs=[
            const((B, latent)),                                # z
            const((latent, H1)),                               # w1
            const((1, H1)),                                    # gamma1
            const((1, H1)),                                    # beta1
            const((H1, H2)),                                   # w2
            const((1, H2)),                                    # gamma2
            const((1, H2)),                                    # beta2
            pl.BlockSpec((H2, tile_n), lambda i, j: (0, j)),   # w3 column tile
            pl.BlockSpec((1, tile_n), lambda i, j: (0, j)),    # b3 column tile
        ],
        out_specs=pl.BlockSpec((tile_b, tile_n), lambda i, j: (i, j)),
        scratch_shapes=[pltpu.VMEM((B, H2), jnp.float32)],     # hidden features
        compiler_params=pltpu.CompilerParams(
            dimension_semantics=("parallel", "arbitrary"),
            vmem_limit_bytes=vmem_limit),
        cost_estimate=pl.CostEstimate(flops=flops,
                                      transcendentals=transcendentals,
                                      bytes_accessed=bytes_accessed),
    )(z, params["w1"], params["g1"], params["be1"],
      params["w2"], params["g2"], params["be2"], w3, b3)

    if out_dim_pad != out_dim:
        flat = flat[:, :out_dim]
    # equivalent of .view(B, *input_shape)
    return flat.reshape((B,) + tuple(input_shape))


# Pure-JAX f32 reference with full PyTorch semantics (incl. b1/b2 biases).
def generator_reference(z, params, input_shape):
    f32 = jnp.float32

    def bn(h, gamma, beta):
        mean = jnp.mean(h, axis=0, keepdims=True)
        var = jnp.mean((h - mean) ** 2, axis=0, keepdims=True)
        return (h - mean) * lax.rsqrt(var + BN_EPS) * gamma + beta

    def leaky(h):
        return jnp.where(h > 0, h, LEAKY_SLOPE * h)

    h = z.astype(f32) @ params["w1"].astype(f32) + params["b1"]
    h = leaky(bn(h, params["g1"], params["be1"]))
    h = h @ params["w2"].astype(f32) + params["b2"]
    h = leaky(bn(h, params["g2"], params["be2"]))
    h = h @ params["w3"].astype(f32) + params["b3"]
    return jnp.tanh(h).reshape((z.shape[0],) + tuple(input_shape))


if __name__ == "__main__":
    latent_dim = 32
    input_shape = (1, 16, 16)   # C, H, W  -> prod = 256
    batch = 8

    key = jax.random.PRNGKey(0)
    k_z, k_p = jax.random.split(key)
    z = jax.random.normal(k_z, (batch, latent_dim), jnp.float32)
    params = make_generator_params(latent_dim, input_shape, k_p)

    out = generator_forward(z, params, input_shape)
    out = jax.block_until_ready(out)

    assert out.shape == (batch,) + input_shape, out.shape
    assert bool(jnp.all(jnp.isfinite(out)))
    assert bool(jnp.all(jnp.abs(out) <= 1.0 + 1e-6))  # tanh range

    # Match the f32 reference (difference only from intentional bf16 operands).
    ref = generator_reference(z, params, input_shape)
    max_err = float(jnp.max(jnp.abs(out - ref)))
    assert max_err < 0.15, f"max abs error vs reference: {max_err}"

    print("KERNEL_OK")
</pallas_src>

<mosaic_0001>
module attributes {stable_mosaic.version = 11 : i64} {
  func.func @_generator_kernel(%arg0: i32, %arg1: i32, %arg2: memref<8x32xf32, #tpu.memory_space<vmem>>, %arg3: memref<32x512xbf16, #tpu.memory_space<vmem>>, %arg4: memref<1x512xf32, #tpu.memory_space<vmem>>, %arg5: memref<1x512xf32, #tpu.memory_space<vmem>>, %arg6: memref<512x256xbf16, #tpu.memory_space<vmem>>, %arg7: memref<1x256xf32, #tpu.memory_space<vmem>>, %arg8: memref<1x256xf32, #tpu.memory_space<vmem>>, %arg9: memref<256x256xbf16, #tpu.memory_space<vmem>>, %arg10: memref<1x256xf32, #tpu.memory_space<vmem>>, %arg11: memref<8x256xf32, #tpu.memory_space<vmem>>, %arg12: memref<8x256xf32, #tpu.memory_space<vmem>>) attributes {dimension_semantics = [#tpu.dimension_semantics<parallel>, #tpu.dimension_semantics<arbitrary>], iteration_bounds = array<i64: 1, 1>, scalar_prefetch = 0 : i64, scratch_operands = 1 : i64, tpu.core_type = #tpu.core_type<tc>, window_params = [{pipeline_mode = #tpu.pipeline_mode<synchronous>, transform_indices = @transform_0, window_bounds = array<i64: 8, 32>}, {pipeline_mode = #tpu.pipeline_mode<synchronous>, transform_indices = @transform_1, window_bounds = array<i64: 32, 512>}, {pipeline_mode = #tpu.pipeline_mode<synchronous>, transform_indices = @transform_2, window_bounds = array<i64: 1, 512>}, {pipeline_mode = #tpu.pipeline_mode<synchronous>, transform_indices = @transform_3, window_bounds = array<i64: 1, 512>}, {pipeline_mode = #tpu.pipeline_mode<synchronous>, transform_indices = @transform_4, window_bounds = array<i64: 512, 256>}, {pipeline_mode = #tpu.pipeline_mode<synchronous>, transform_indices = @transform_5, window_bounds = array<i64: 1, 256>}, {pipeline_mode = #tpu.pipeline_mode<synchronous>, transform_indices = @transform_6, window_bounds = array<i64: 1, 256>}, {transform_indices = @transform_7, window_bounds = array<i64: 256, 256>}, {transform_indices = @transform_8, window_bounds = array<i64: 1, 256>}, {transform_indices = @transform_9, window_bounds = array<i64: 8, 256>}]} {
    %c0_i32 = arith.constant 0 : i32
    %0 = arith.cmpi eq, %arg1, %c0_i32 : i32
    %1 = arith.extui %0 : i1 to i32
    %c0_i32_0 = arith.constant 0 : i32
    %2 = arith.cmpi ne, %1, %c0_i32_0 : i32
    scf.if %2 {
      %c0_7 = arith.constant 0 : index
      %c0_8 = arith.constant 0 : index
      %15 = vector.load %arg2[%c0_7, %c0_8] : memref<8x32xf32, #tpu.memory_space<vmem>>, vector<8x32xf32>
      %16 = arith.truncf %15 : vector<8x32xf32> to vector<8x32xbf16>
      %c0_9 = arith.constant 0 : index
      %c0_10 = arith.constant 0 : index
      %17 = vector.load %arg3[%c0_9, %c0_10] : memref<32x512xbf16, #tpu.memory_space<vmem>>, vector<32x512xbf16>
      %cst_11 = arith.constant dense<0.000000e+00> : vector<8x512xf32>
      %18 = tpu.matmul %16, %17, %cst_11 {dimension_numbers = #tpu.dot_dimension_numbers<[1], [0], [0], [1], [0, 0, 1, 1], [], []>} : vector<8x32xbf16>, vector<32x512xbf16>, vector<8x512xf32> -> vector<8x512xf32>
      %c0_12 = arith.constant 0 : index
      %c0_13 = arith.constant 0 : index
      %19 = vector.load %arg4[%c0_12, %c0_13] : memref<1x512xf32, #tpu.memory_space<vmem>>, vector<1x512xf32>
      %c0_14 = arith.constant 0 : index
      %c0_15 = arith.constant 0 : index
      %20 = vector.load %arg5[%c0_14, %c0_15] : memref<1x512xf32, #tpu.memory_space<vmem>>, vector<1x512xf32>
      %cst_16 = arith.constant dense<0.000000e+00> : vector<512xf32>
      %21 = vector.multi_reduction <add>, %18, %cst_16 [0] : vector<8x512xf32> to vector<512xf32>
      %22 = vector.shape_cast %21 : vector<512xf32> to vector<1x512xf32>
      %cst_17 = arith.constant 8.000000e+00 : f32
      %23 = vector.broadcast %cst_17 : f32 to vector<1x512xf32>
      %24 = arith.divf %22, %23 : vector<1x512xf32>
      %25 = vector.broadcast %24 : vector<1x512xf32> to vector<8x512xf32>
      %26 = arith.subf %18, %25 : vector<8x512xf32>
      %27 = arith.mulf %26, %26 : vector<8x512xf32>
      %cst_18 = arith.constant dense<0.000000e+00> : vector<512xf32>
      %28 = vector.multi_reduction <add>, %27, %cst_18 [0] : vector<8x512xf32> to vector<512xf32>
      %29 = vector.shape_cast %28 : vector<512xf32> to vector<1x512xf32>
      %cst_19 = arith.constant 8.000000e+00 : f32
      %30 = vector.broadcast %cst_19 : f32 to vector<1x512xf32>
      %31 = arith.divf %29, %30 : vector<1x512xf32>
      %cst_20 = arith.constant 9.99999974E-6 : f32
      %32 = vector.broadcast %cst_20 : f32 to vector<1x512xf32>
      %33 = arith.addf %31, %32 : vector<1x512xf32>
      %34 = math.rsqrt %33 : vector<1x512xf32>
      %35 = arith.mulf %19, %34 : vector<1x512xf32>
      %36 = arith.mulf %24, %35 : vector<1x512xf32>
      %37 = arith.subf %20, %36 : vector<1x512xf32>
      %38 = vector.broadcast %35 : vector<1x512xf32> to vector<8x512xf32>
      %39 = arith.mulf %18, %38 : vector<8x512xf32>
      %40 = vector.broadcast %37 : vector<1x512xf32> to vector<8x512xf32>
      %41 = arith.addf %39, %40 : vector<8x512xf32>
      %cst_21 = arith.constant 0.000000e+00 : f32
      %42 = vector.broadcast %cst_21 : f32 to vector<8x512xf32>
      %43 = arith.cmpf ogt, %41, %42 : vector<8x512xf32>
      %cst_22 = arith.constant 2.000000e-01 : f32
      %44 = vector.broadcast %cst_22 : f32 to vector<8x512xf32>
      %45 = arith.mulf %44, %41 : vector<8x512xf32>
      %46 = arith.select %43, %41, %45 : vector<8x512xi1>, vector<8x512xf32>
      %47 = arith.truncf %46 : vector<8x512xf32> to vector<8x512xbf16>
      %c0_23 = arith.constant 0 : index
      %c0_24 = arith.constant 0 : index
      %48 = vector.load %arg6[%c0_23, %c0_24] : memref<512x256xbf16, #tpu.memory_space<vmem>>, vector<512x256xbf16>
      %cst_25 = arith.constant dense<0.000000e+00> : vector<8x256xf32>
      %49 = tpu.matmul %47, %48, %cst_25 {dimension_numbers = #tpu.dot_dimension_numbers<[1], [0], [0], [1], [0, 0, 1, 1], [], []>} : vector<8x512xbf16>, vector<512x256xbf16>, vector<8x256xf32> -> vector<8x256xf32>
      %c0_26 = arith.constant 0 : index
      %c0_27 = arith.constant 0 : index
      %50 = vector.load %arg7[%c0_26, %c0_27] : memref<1x256xf32, #tpu.memory_space<vmem>>, vector<1x256xf32>
      %c0_28 = arith.constant 0 : index
      %c0_29 = arith.constant 0 : index
      %51 = vector.load %arg8[%c0_28, %c0_29] : memref<1x256xf32, #tpu.memory_space<vmem>>, vector<1x256xf32>
      %cst_30 = arith.constant dense<0.000000e+00> : vector<256xf32>
      %52 = vector.multi_reduction <add>, %49, %cst_30 [0] : vector<8x256xf32> to vector<256xf32>
      %53 = vector.shape_cast %52 : vector<256xf32> to vector<1x256xf32>
      %cst_31 = arith.constant 8.000000e+00 : f32
      %54 = vector.broadcast %cst_31 : f32 to vector<1x256xf32>
      %55 = arith.divf %53, %54 : vector<1x256xf32>
      %56 = vector.broadcast %55 : vector<1x256xf32> to vector<8x256xf32>
      %57 = arith.subf %49, %56 : vector<8x256xf32>
      %58 = arith.mulf %57, %57 : vector<8x256xf32>
      %cst_32 = arith.constant dense<0.000000e+00> : vector<256xf32>
      %59 = vector.multi_reduction <add>, %58, %cst_32 [0] : vector<8x256xf32> to vector<256xf32>
      %60 = vector.shape_cast %59 : vector<256xf32> to vector<1x256xf32>
      %cst_33 = arith.constant 8.000000e+00 : f32
      %61 = vector.broadcast %cst_33 : f32 to vector<1x256xf32>
      %62 = arith.divf %60, %61 : vector<1x256xf32>
      %cst_34 = arith.constant 9.99999974E-6 : f32
      %63 = vector.broadcast %cst_34 : f32 to vector<1x256xf32>
      %64 = arith.addf %62, %63 : vector<1x256xf32>
      %65 = math.rsqrt %64 : vector<1x256xf32>
      %66 = arith.mulf %50, %65 : vector<1x256xf32>
      %67 = arith.mulf %55, %66 : vector<1x256xf32>
      %68 = arith.subf %51, %67 : vector<1x256xf32>
      %69 = vector.broadcast %66 : vector<1x256xf32> to vector<8x256xf32>
      %70 = arith.mulf %49, %69 : vector<8x256xf32>
      %71 = vector.broadcast %68 : vector<1x256xf32> to vector<8x256xf32>
      %72 = arith.addf %70, %71 : vector<8x256xf32>
      %cst_35 = arith.constant 0.000000e+00 : f32
      %73 = vector.broadcast %cst_35 : f32 to vector<8x256xf32>
      %74 = arith.cmpf ogt, %72, %73 : vector<8x256xf32>
      %cst_36 = arith.constant 2.000000e-01 : f32
      %75 = vector.broadcast %cst_36 : f32 to vector<8x256xf32>
      %76 = arith.mulf %75, %72 : vector<8x256xf32>
      %77 = arith.select %74, %72, %76 : vector<8x256xi1>, vector<8x256xf32>
      %c0_37 = arith.constant 0 : index
      %c0_38 = arith.constant 0 : index
      %78 = vector.load %arg12[%c0_37, %c0_38] : memref<8x256xf32, #tpu.memory_space<vmem>>, vector<8x256xf32>
      tpu.vector_store %arg12[%c0_37, %c0_38], %77 {strides = array<i32>} : memref<8x256xf32, #tpu.memory_space<vmem>>, vector<8x256xf32>,
    } else {
    }
    %c8_i32 = arith.constant 8 : i32
    %3 = arith.muli %arg0, %c8_i32 : i32
    %4 = tpu.assume_multiple %3, 8 : i32
    %5 = arith.index_cast %4 : i32 to index
    %c0 = arith.constant 0 : index
    %6 = vector.load %arg12[%5, %c0] : memref<8x256xf32, #tpu.memory_space<vmem>>, vector<8x256xf32>
    %7 = arith.truncf %6 : vector<8x256xf32> to vector<8x256xbf16>
    %c0_1 = arith.constant 0 : index
    %c0_2 = arith.constant 0 : index
    %8 = vector.load %arg9[%c0_1, %c0_2] : memref<256x256xbf16, #tpu.memory_space<vmem>>, vector<256x256xbf16>
    %cst = arith.constant dense<0.000000e+00> : vector<8x256xf32>
    %9 = tpu.matmul %7, %8, %cst {dimension_numbers = #tpu.dot_dimension_numbers<[1], [0], [0], [1], [0, 0, 1, 1], [], []>} : vector<8x256xbf16>, vector<256x256xbf16>, vector<8x256xf32> -> vector<8x256xf32>
    %c0_3 = arith.constant 0 : index
    %c0_4 = arith.constant 0 : index
    %10 = vector.load %arg10[%c0_3, %c0_4] : memref<1x256xf32, #tpu.memory_space<vmem>>, vector<1x256xf32>
    %11 = vector.broadcast %10 : vector<1x256xf32> to vector<8x256xf32>
    %12 = arith.addf %9, %11 : vector<8x256xf32>
    %13 = math.tanh %12 : vector<8x256xf32>
    %c0_5 = arith.constant 0 : index
    %c0_6 = arith.constant 0 : index
    %14 = vector.load %arg11[%c0_5, %c0_6] : memref<8x256xf32, #tpu.memory_space<vmem>>, vector<8x256xf32>
    tpu.vector_store %arg11[%c0_5, %c0_6], %13 {strides = array<i32>} : memref<8x256xf32, #tpu.memory_space<vmem>>, vector<8x256xf32>,
    return
  }
  func.func @transform_0(%arg0: i32, %arg1: i32) -> (i32, i32) {
    %c0_i32 = arith.constant 0 : i32
    %c0_i32_0 = arith.constant 0 : i32
    %c0_i32_1 = arith.constant 0 : i32
    return %c0_i32, %c0_i32_0 : i32, i32
  }
  func.func @transform_1(%arg0: i32, %arg1: i32) -> (i32, i32) {
    %c0_i32 = arith.constant 0 : i32
    %c0_i32_0 = arith.constant 0 : i32
    %c0_i32_1 = arith.constant 0 : i32
    return %c0_i32, %c0_i32_0 : i32, i32
  }
  func.func @transform_2(%arg0: i32, %arg1: i32) -> (i32, i32) {
    %c0_i32 = arith.constant 0 : i32
    %c0_i32_0 = arith.constant 0 : i32
    %c0_i32_1 = arith.constant 0 : i32
    return %c0_i32, %c0_i32_0 : i32, i32
  }
  func.func @transform_3(%arg0: i32, %arg1: i32) -> (i32, i32) {
    %c0_i32 = arith.constant 0 : i32
    %c0_i32_0 = arith.constant 0 : i32
    %c0_i32_1 = arith.constant 0 : i32
    return %c0_i32, %c0_i32_0 : i32, i32
  }
  func.func @transform_4(%arg0: i32, %arg1: i32) -> (i32, i32) {
    %c0_i32 = arith.constant 0 : i32
    %c0_i32_0 = arith.constant 0 : i32
    %c0_i32_1 = arith.constant 0 : i32
    return %c0_i32, %c0_i32_0 : i32, i32
  }
  func.func @transform_5(%arg0: i32, %arg1: i32) -> (i32, i32) {
    %c0_i32 = arith.constant 0 : i32
    %c0_i32_0 = arith.constant 0 : i32
    %c0_i32_1 = arith.constant 0 : i32
    return %c0_i32, %c0_i32_0 : i32, i32
  }
  func.func @transform_6(%arg0: i32, %arg1: i32) -> (i32, i32) {
    %c0_i32 = arith.constant 0 : i32
    %c0_i32_0 = arith.constant 0 : i32
    %c0_i32_1 = arith.constant 0 : i32
    return %c0_i32, %c0_i32_0 : i32, i32
  }
  func.func @transform_7(%arg0: i32, %arg1: i32) -> (i32, i32) {
    %c0_i32 = arith.constant 0 : i32
    %c0_i32_0 = arith.constant 0 : i32
    return %c0_i32, %arg1 : i32, i32
  }
  func.func @transform_8(%arg0: i32, %arg1: i32) -> (i32, i32) {
    %c0_i32 = arith.constant 0 : i32
    %c0_i32_0 = arith.constant 0 : i32
    return %c0_i32, %arg1 : i32, i32
  }
  func.func @transform_9(%arg0: i32, %arg1: i32) -> (i32, i32) {
    %c0_i32 = arith.constant 0 : i32
    return %arg0, %arg1 : i32, i32
  }
}

</mosaic_0001>

<bundles_post_ra>
// kernel: tpu_custom_call.1
= control target key start
LH: loop header
LB: loop body
LE: loop exit
PB: predicated region body
PF: predicated region fallthrough
CT: control target
= control target key end

     0   :  { %14 = vsyncpa [#allocation4], 0  ;;  %s1906_s0 = inlined_call_operand.hbm [shape: f32[8,32], index: 0, kind: input, shape index: {}]   ;;  %s1907_s1 = inlined_call_operand.hbm [shape: bf16[32,512], index: 1, kind: input, shape index: {}]   ;;  %s1908_s2 = inlined_call_operand.vmem [shape: f32[1,512], index: 2, kind: input, shape index: {}]   ;;  %s1909_s3 = inlined_call_operand.vmem [shape: f32[1,512], index: 3, kind: input, shape index: {}]   ;;  %s1910_s4 = inlined_call_operand.hbm [shape: bf16[512,256], index: 4, kind: input, shape index: {}]   ;;  %s1911_s5 = inlined_call_operand.vmem [shape: f32[1,256], index: 5, kind: input, shape index: {}]   ;;  %s1912_s6 = inlined_call_operand.vmem [shape: f32[1,256], index: 6, kind: input, shape index: {}]   ;;  %s1913_s7 = inlined_call_operand.hbm [shape: bf16[256,256], index: 7, kind: input, shape index: {}]   ;;  %s1914_s8 = inlined_call_operand.vmem [shape: f32[1,256], index: 8, kind: input, shape index: {}]   ;;  %s1915_s9 = inlined_call_operand.hbm [shape: f32[8,256], index: 9, kind: output, shape index: {}]  }
   0x1   :  { %15 = vsyncpa [#allocation7], 0 }
   0x2   :  { %16 = vsyncpa [#allocation10], 0 }
   0x3   :  { %17 = vsyncpa [#allocation5], 0  ;;  %s1699_s30 = smov [#allocation6]   ;;  %s1581_s13 = scalar_lea.hbm %s1907_s1, 1024 }
   0x4   :  { %s33_s10 = sshll.u32 %s1699_s30, 4  ;;  %p1582_p0 = scmp.ne.s32.totalorder %s1907_s1, %s1581_s13  ;;  %s34_s10 = int_to_ptr.vmem [resolvable:$true] %s33_s10 }
   0x5   :  { %p1585_p1 = scmp.lt.u32.totalorder %s1581_s13, %s1907_s1 }
   0x7   :  { %p1587_p2 = pnand %p1585_p1, %p1582_p0 }
   0x9   :  { %1590 = shalt.err (!%p1587_p2)
}
   0xa   :  { %s1591_s18 = scalar_lea.vmem %s34_s10, 1024  ;;  %p1596_p4 = scmp.lt.s32.totalorder %s34_s10, %s34_s10 }
   0xb   :  { %p1592_p3 = scmp.ne.s32.totalorder %s34_s10, %s1591_s18  ;;  %p1597_p5 = scmp.lt.s32.totalorder %s1591_s18, %s1591_s18 }
   0xd   :  { %p1598_p6 = por %p1597_p5, %p1596_p4 }
   0xf   :  { %p1599_p7 = pnand %p1598_p6, %p1592_p3 }
  0x11   :  { %1602 = shalt.err (!%p1599_p7)
}
  0x12   :  { %s1700_s19 = smov 256   ;;  %s1701_s20 = smov 16  }
  0x13   :  { %39 = dma.hbm_to_vmem [thread:$0]  %s1907_s1, 1024, %s34_s10, [#allocation7], %s1700_s19, %s1700_s19, %s1701_s20  }
  0x14   :  { %s1702_s23 = smov [#allocation3]   ;;  %s1703_s25 = smov [#allocation8]  }
  0x15   :  { %s24_s24 = sshll.u32 %s1702_s23, 4  ;;  %s49_s26 = sshll.u32 %s1703_s25, 4  ;;  %s25_s24 = int_to_ptr.vmem [resolvable:$true] %s24_s24  ;;  %s50_s26 = int_to_ptr.vmem [resolvable:$true] %s49_s26 }
  0x16   :  { %s1603_s29 = scalar_lea.hbm %s1906_s0, 128 }
  0x17   :  { %p1604_p8 = scmp.ne.s32.totalorder %s1906_s0, %s1603_s29  ;;  %p1607_p9 = scmp.lt.u32.totalorder %s1603_s29, %s1906_s0 }
  0x19   :  { %p1609_p10 = pnand %p1607_p9, %p1604_p8 }
  0x1b   :  { %1612 = shalt.err (!%p1609_p10)
}
  0x1c   :  { %s1613_s1 = scalar_lea.vmem %s25_s24, 128  ;;  %p1618_p12 = scmp.lt.s32.totalorder %s25_s24, %s25_s24 }
  0x1d   :  { %p1614_p11 = scmp.ne.s32.totalorder %s25_s24, %s1613_s1  ;;  %p1619_p13 = scmp.lt.s32.totalorder %s1613_s1, %s1613_s1 }
  0x1f   :  { %p1620_p0 = por %p1619_p13, %p1618_p12 }
  0x21   :  { %p1621_p1 = pnand %p1620_p0, %p1614_p11 }
  0x23   :  { %1624 = shalt.err (!%p1621_p1)
}
  0x24   :  { %27 = dma.hbm_to_vmem [thread:$0]  %s1906_s0, 128, %s25_s24, [#allocation4]  }
  0x25   :  { %s1625_s17 = scalar_lea.hbm %s1910_s4, 8192 }
  0x26   :  { %p1626_p2 = scmp.ne.s32.totalorder %s1910_s4, %s1625_s17  ;;  %p1629_p3 = scmp.lt.u32.totalorder %s1625_s17, %s1910_s4 }
  0x28   :  { %p1631_p4 = pnand %p1629_p3, %p1626_p2 }
  0x2a   :  { %1634 = shalt.err (!%p1631_p4)
}
  0x2b   :  { %s1635_s22 = scalar_lea.vmem %s50_s26, 8192  ;;  %p1640_p6 = scmp.lt.s32.totalorder %s50_s26, %s50_s26 }
  0x2c   :  { %p1636_p5 = scmp.ne.s32.totalorder %s50_s26, %s1635_s22  ;;  %p1641_p7 = scmp.lt.s32.totalorder %s1635_s22, %s1635_s22 }
  0x2e   :  { %p1642_p8 = por %p1641_p7, %p1640_p6 }
  0x30   :  { %p1643_p9 = pnand %p1642_p8, %p1636_p5 }
  0x32   :  { %1646 = shalt.err (!%p1643_p9)
}
  0x33   :  { %s1704_s0 = smov 128   ;;  %s1705_s23 = smov 8  }
  0x34   :  { %55 = dma.hbm_to_vmem [thread:$0]  %s1910_s4, 8192, %s50_s26, [#allocation7], %s1704_s0, %s1704_s0, %s1705_s23  }
  0x35   :  { %s1706_s27 = smov [#allocation9]   ;;  %s1647_s11 = scalar_lea.hbm %s1913_s7, 4096 }
  0x36   :  { %s65_s28 = sshll.u32 %s1706_s27, 4  ;;  %p1648_p10 = scmp.ne.s32.totalorder %s1913_s7, %s1647_s11  ;;  %s66_s28 = int_to_ptr.vmem [resolvable:$true] %s65_s28 }
  0x37   :  { %p1651_p11 = scmp.lt.u32.totalorder %s1647_s11, %s1913_s7 }
  0x39   :  { %p1653_p12 = pnand %p1651_p11, %p1648_p10 }
  0x3b   :  { %1656 = shalt.err (!%p1653_p12)
}
  0x3c   :  { %s1657_s14 = scalar_lea.vmem %s66_s28, 4096  ;;  %p1662_p0 = scmp.lt.s32.totalorder %s66_s28, %s66_s28 }
  0x3d   :  { %p1658_p13 = scmp.ne.s32.totalorder %s66_s28, %s1657_s14  ;;  %p1663_p1 = scmp.lt.s32.totalorder %s1657_s14, %s1657_s14 }
  0x3f   :  { %p1664_p2 = por %p1663_p1, %p1662_p0 }
  0x41   :  { %p1665_p3 = pnand %p1664_p2, %p1658_p13 }
  0x43   :  { %1668 = shalt.err (!%p1665_p3)
}
  0x44   :  { %71 = dma.hbm_to_vmem [thread:$0]  %s1913_s7, 4096, %s66_s28, [#allocation10], %s1704_s0, %s1704_s0, %s1705_s23  }
  0x45   :  { %1691 = dma.done.wait [#allocation4], 128  }
  0x46   :  { %1692 = vsyncadd [#allocation4], 4294967168 }
  0x47   :  { %1693 = dma.done.wait [#allocation7], 9216  }
  0x48   :  { %1694 = vsyncadd [#allocation7], 4294958080 }
  0x49   :  { %1695 = dma.done.wait [#allocation10], 4096  }
  0x4a   :  { %1696 = vsyncadd [#allocation10], 4294963200  ;;  %v1707_v0 = vmov 0   ;;  %v1409_v1 = vld [vmem:[#allocation6 + $0x4] ss:$16 sps:$4 sm:$0xff]   ;;  %v91_v5 = vld [vmem:[#allocation3] sm:$0xff] }
  0x4b   :  { %177 = vmatprep.mubr.bf16.mxu1 %v1707_v0  ;;  %v1411_v2 = vld [vmem:[#allocation6] ss:$16 sps:$4 sm:$0xff]   ;;  %145 = vmatprep.subr.bf16.mxu1 %v1409_v1  ;;  %v1412_v3 = vld [vmem:[#allocation6 + $0x24] ss:$16 sps:$4 sm:$0xff]   ;;  %v1417_v6 = vld [vmem:[#allocation6 + $0xc] ss:$16 sps:$4 sm:$0xff]   ;;  %v92_v8 = vpack.c.bf16 %v91_v5, %v91_v5 }
  0x4c   :  { %v1414_v4 = vld [vmem:[#allocation6 + $0x20] ss:$16 sps:$4 sm:$0xff]   ;;  %146 = vmatpush1.bf16.msra.mxu1 %v1411_v2  ;;  %v1415_v7 = vld [vmem:[#allocation6 + $0x8] ss:$16 sps:$4 sm:$0xff]   ;;  %v1420_v9 = vld [vmem:[#allocation6 + $0x2c] ss:$16 sps:$4 sm:$0xff]  }
  0x4d   :  { %147 = vmatprep.subr.bf16.mxu1 %v1412_v3  ;;  %vm141_vm0 = vcmask 261120   ;;  %v1418_v10 = vld [vmem:[#allocation6 + $0x28] ss:$16 sps:$4 sm:$0xff]   ;;  %v1421_v11 = vld [vmem:[#allocation8 + $0x4] ss:$8 sps:$4 sm:$0xff]   ;;  %s1709_s20 = smov [#allocation11]  }
  0x4e   :  { %v1423_v12 = vld [vmem:[#allocation8] ss:$8 sps:$4 sm:$0xff]   ;;  %816 = vmatprep.subr.bf16.mxu0 %v1421_v11  ;;  %v1424_v13 = vld [vmem:[#allocation8 + $0x14] ss:$8 sps:$4 sm:$0xff]   ;;  %v1426_v14 = vld [vmem:[#allocation8 + $0x10] ss:$8 sps:$4 sm:$0xff]  }
  0x4f   :  { %817 = vmatpush1.bf16.msra.mxu0 %v1423_v12  ;;  %v1427_v15 = vld [vmem:[#allocation8 + $0x24] ss:$8 sps:$4 sm:$0xff]   ;;  %v1429_v16 = vld [vmem:[#allocation8 + $0x20] ss:$8 sps:$4 sm:$0xff]   ;;  %v1430_v17 = vld [vmem:[#allocation8 + $0x34] ss:$8 sps:$4 sm:$0xff]  }
  0x50   :  { %148 = vmatpush1.bf16.msra.mxu1 %v1414_v4  ;;  %818 = vmatprep.subr.bf16.mxu0 %v1424_v13  ;;  %v1432_v18 = vld [vmem:[#allocation8 + $0x30] ss:$8 sps:$4 sm:$0xff]   ;;  %v1433_v19 = vld [vmem:[#allocation8 + $0x44] ss:$8 sps:$4 sm:$0xff]   ;;  %v1435_v20 = vld [vmem:[#allocation8 + $0x40] ss:$8 sps:$4 sm:$0xff]  }
  0x51   :  { %186 = vmatprep.subr.bf16.mxu1 %v1417_v6  ;;  %v1436_v21 = vld [vmem:[#allocation8 + $0x54] ss:$8 sps:$4 sm:$0xff]   ;;  %v1438_v22 = vld [vmem:[#allocation8 + $0x50] ss:$8 sps:$4 sm:$0xff]   ;;  %v1439_v23 = vld [vmem:[#allocation8 + $0x64] ss:$8 sps:$4 sm:$0xff]  }
  0x52   :  { %v1441_v24 = vld [vmem:[#allocation8 + $0x60] ss:$8 sps:$4 sm:$0xff]   ;;  %v1442_v25 = vld [vmem:[#allocation8 + $0x74] ss:$8 sps:$4 sm:$0xff]   ;;  %v1444_v26 = vld [vmem:[#allocation8 + $0x70] ss:$8 sps:$4 sm:$0xff]  }
  0x53   :  { %1296 = vmatmul.mubr.msk.bf16.vlgmr.msra.gmra.mrb[0].mxu1 %vm141_vm0, %v92_v8  ;;  %819 = vmatpush1.bf16.msra.mxu0 %v1426_v14  ;;  %v1445_v27 = vld [vmem:[#allocation8 + $0x84] ss:$8 sps:$4 sm:$0xff]   ;;  %v1447_v28 = vld [vmem:[#allocation8 + $0x80] ss:$8 sps:$4 sm:$0xff]   ;;  %v1448_v29 = vld [vmem:[#allocation8 + $0x94] ss:$8 sps:$4 sm:$0xff]  }
  0x54   :  { %187 = vmatpush1.bf16.msra.mxu1 %v1415_v7  ;;  %218 = vmatprep.mubr.bf16.mxu1 %v1707_v0  ;;  %v1450_v30 = vld [vmem:[#allocation8 + $0x90] ss:$8 sps:$4 sm:$0xff]   ;;  %v1451_v31 = vld [vmem:[#allocation8 + $0xa4] ss:$8 sps:$4 sm:$0xff]   ;;  %v1453_v32 = vld [vmem:[#allocation8 + $0xa0] ss:$8 sps:$4 sm:$0xff]  }
  0x55   :  { %188 = vmatprep.subr.bf16.mxu1 %v1420_v9  ;;  %820 = vmatprep.subr.bf16.mxu0 %v1427_v15  ;;  %v1454_v33 = vld [vmem:[#allocation8 + $0xb4] ss:$8 sps:$4 sm:$0xff]   ;;  %v1456_v34 = vld [vmem:[#allocation8 + $0xb0] ss:$8 sps:$4 sm:$0xff]   ;;  %v1457_v35 = vld [vmem:[#allocation8 + $0xc4] ss:$8 sps:$4 sm:$0xff]  }
  0x56   :  { %v1459_v36 = vld [vmem:[#allocation8 + $0xc0] ss:$8 sps:$4 sm:$0xff]   ;;  %v1460_v37 = vld [vmem:[#allocation8 + $0xd4] ss:$8 sps:$4 sm:$0xff]   ;;  %v1462_v38 = vld [vmem:[#allocation8 + $0xd0] ss:$8 sps:$4 sm:$0xff]  }
  0x57   :  { %821 = vmatpush1.bf16.msra.mxu0 %v1429_v16  ;;  %v1463_v39 = vld [vmem:[#allocation8 + $0xe4] ss:$8 sps:$4 sm:$0xff]   ;;  %v1465_v40 = vld [vmem:[#allocation8 + $0xe0] ss:$8 sps:$4 sm:$0xff]   ;;  %v1466_v41 = vld [vmem:[#allocation8 + $0xf4] ss:$8 sps:$4 sm:$0xff]  }
  0x58   :  { %189 = vmatpush1.bf16.msra.mxu1 %v1418_v10  ;;  %822 = vmatprep.subr.bf16.mxu0 %v1430_v17  ;;  %v1468_v42 = vld [vmem:[#allocation8 + $0xf0] ss:$8 sps:$4 sm:$0xff]   ;;  %v1471_v43 = vld [vmem:[#allocation8 + $0x104] ss:$8 sps:$4 sm:$0xff]   ;;  %s1275_s21 = sshll.u32 %s1709_s20, 4  ;;  %s1276_s21 = int_to_ptr.vmem [resolvable:$true] %s1275_s21 }
  0x59   :  { %p1674_p5 = scmp.lt.s32.totalorder %s1276_s21, %s1276_s21 }
  0x5b   :  { %1297 = vmatmul.mubr.msk.bf16.vlgmr.msra.gmra.mrb[4].mxu1 %vm141_vm0, %v92_v8  ;;  %823 = vmatpush1.bf16.msra.mxu0 %v1432_v18 }
  0x5c   :  { %824 = vmatprep.subr.bf16.mxu0 %v1433_v19 }
  0x5f   :  { %825 = vmatpush1.bf16.msra.mxu0 %v1435_v20 }
  0x60   :  { %826 = vmatprep.subr.bf16.mxu0 %v1436_v21 }
  0x63   :  { %827 = vmatpush1.bf16.msra.mxu0 %v1438_v22 }
  0x64   :  { %828 = vmatprep.subr.bf16.mxu0 %v1439_v23 }
  0x67   :  { %829 = vmatpush1.bf16.msra.mxu0 %v1441_v24 }
  0x68   :  { %830 = vmatprep.subr.bf16.mxu0 %v1442_v25 }
  0x6b   :  { %831 = vmatpush1.bf16.msra.mxu0 %v1444_v26 }
  0x6c   :  { %832 = vmatprep.subr.bf16.mxu0 %v1445_v27 }
  0x6f   :  { %833 = vmatpush1.bf16.msra.mxu0 %v1447_v28 }
  0x70   :  { %834 = vmatprep.subr.bf16.mxu0 %v1448_v29 }
  0x73   :  { %835 = vmatpush1.bf16.msra.mxu0 %v1450_v30 }
  0x74   :  { %836 = vmatprep.subr.bf16.mxu0 %v1451_v31 }
  0x77   :  { %837 = vmatpush1.bf16.msra.mxu0 %v1453_v32 }
  0x78   :  { %838 = vmatprep.subr.bf16.mxu0 %v1454_v33 }
  0x7b   :  { %839 = vmatpush1.bf16.msra.mxu0 %v1456_v34 }
  0x7c   :  { %840 = vmatprep.subr.bf16.mxu0 %v1457_v35 }
  0x7f   :  { %841 = vmatpush1.bf16.msra.mxu0 %v1459_v36 }
  0x80   :  { %842 = vmatprep.subr.bf16.mxu0 %v1460_v37 }
  0x83   :  { %843 = vmatpush1.bf16.msra.mxu0 %v1462_v38 }
  0x84   :  { %844 = vmatprep.subr.bf16.mxu0 %v1463_v39 }
  0x87   :  { %845 = vmatpush1.bf16.msra.mxu0 %v1465_v40 }
  0x88   :  { %846 = vmatprep.subr.bf16.mxu0 %v1466_v41 }
  0x8b   :  { %847 = vmatpush1.bf16.msra.mxu0 %v1468_v42 }
  0x8c   :  { %857 = vmatprep.subr.bf16.mxu0 %v1471_v43 }
 0x126   :  { %v1808_v44 = vpop.f32.mrb[0].mxu1 }
 0x127   :  { %v229_v45 = vrot.slane %v1808_v44, 4  ;;  %v1811_v46 = vpop.f32.mrb[1].mxu1 }
 0x128   :  { %v235_v47 = vrot.slane %v1811_v46, 4  ;;  %v183_v48 = vpop.f32.mrb[2].mxu1 }
 0x129   :  { %v230_v49 = vadd.f32 %v229_v45, %v1808_v44  ;;  %v184_v50 = vpop.f32.mrb[3].mxu1 }
 0x12a   :  { %v236_v51 = vadd.f32 %v235_v47, %v1811_v46 }
 0x12b   :  { %v231_v52 = vrot.slane %v230_v49, 2 }
 0x12c   :  { %v237_v53 = vrot.slane %v236_v51, 2 }
 0x12d   :  { %v232_v54 = vadd.f32 %v231_v52, %v230_v49 }
 0x12e   :  { %v238_v55 = vadd.f32 %v237_v53, %v236_v51  ;;  %v1816_v56 = vpop.f32.mrb[4].mxu1 }
 0x12f   :  { %v233_v57 = vrot.slane %v232_v54, 1  ;;  %v241_v58 = vrot.slane %v1816_v56, 4  ;;  %v1819_v59 = vpop.f32.mrb[5].mxu1 }
 0x130   :  { %v239_v60 = vrot.slane %v238_v55, 1  ;;  %v247_v61 = vrot.slane %v1819_v59, 4  ;;  %v224_v62 = vpop.f32.mrb[6].mxu1 }
 0x131   :  { %v234_v63 = vadd.f32 %v233_v57, %v232_v54  ;;  %v242_v0 = vadd.f32 %v241_v58, %v1816_v56  ;;  %v225_v1 = vpop.f32.mrb[7].mxu1 }
 0x132   :  { %v240_v2 = vadd.f32 %v239_v60, %v238_v55  ;;  %v248_v3 = vadd.f32 %v247_v61, %v1819_v59  ;;  %v1708_v61 = vmov 1966171168  }
 0x133   :  { %v1824_v4 = vmul.f32 0.125, %v234_v63  ;;  %v243_v5 = vrot.slane %v242_v0, 2  ;;  %v309_v62 = vunpack.c.l.s4 %v1708_v61  ;;  %v311_v63 = vlaneseq  ;;  %v1478_v61 = vld [vmem:[#allocation8 + $0x130] ss:$8 sps:$4 sm:$0xff]  }
 0x134   :  { %v1826_v6 = vmul.f32 0.125, %v240_v2  ;;  %v249_v7 = vrot.slane %v248_v3, 2 }
 0x135   :  { %v258_v8 = vsub.f32 %v1808_v44, %v1824_v4  ;;  %v244_v9 = vadd.f32 %v243_v5, %v242_v0  ;;  %v310_v2 = vunpack.c.0.s8 %v309_v62  ;;  %v1483_v62 = vld [vmem:[#allocation8 + $0x144] ss:$8 sps:$4 sm:$0xff]  }
 0x136   :  { %v259_v10 = vsub.f32 %v1811_v46, %v1826_v6  ;;  %v250_v11 = vadd.f32 %v249_v7, %v248_v3  ;;  %v312_v3 = vshrl.u32 %v311_v63, 7  ;;  %v1481_v63 = vld [vmem:[#allocation8 + $0x140] ss:$8 sps:$4 sm:$0xff]  }
 0x137   :  { %v262_v12 = vmul.f32 %v258_v8, %v258_v8  ;;  %v245_v13 = vrot.slane %v244_v9, 1 }
 0x138   :  { %v263_v14 = vmul.f32 %v259_v10, %v259_v10  ;;  %v251_v15 = vrot.slane %v250_v11, 1  ;;  %v1840_v7 = vsub.s32 %v310_v2, %v312_v3  ;;  %v1489_v2 = vld [vmem:[#allocation8 + $0x164] ss:$8 sps:$4 sm:$0xff]  }
 0x139   :  { %v266_v16 = vrot.slane %v262_v12, 4  ;;  %v246_v17 = vadd.f32 %v245_v13, %v244_v9  ;;  %v227_v13 = vld [vmem:[%s1908_s2] sm:$0xf] }
 0x13a   :  { %v272_v18 = vrot.slane %v263_v14, 4  ;;  %v252_v19 = vadd.f32 %v251_v15, %v250_v11 }
 0x13b   :  { %v267_v20 = vadd.f32 %v266_v16, %v262_v12  ;;  %v1832_v21 = vmul.f32 0.125, %v246_v17  ;;  %v1850_v16 = vsub.s32 1, %v312_v3  ;;  %v343_v17 = vsub.s32 2, %v312_v3 }
 0x13c   :  { %v273_v22 = vadd.f32 %v272_v18, %v263_v14  ;;  %v1834_v23 = vmul.f32 0.125, %v252_v19  ;;  %v1847_v14 = vsub.s32 0, %v312_v3  ;;  %v347_v18 = vsub.s32 3, %v312_v3  ;;  %v1487_v3 = vld [vmem:[#allocation8 + $0x160] ss:$8 sps:$4 sm:$0xff]  }
 0x13d   :  { %v268_v24 = vrot.slane %v267_v20, 2  ;;  %v260_v25 = vsub.f32 %v1816_v56, %v1832_v21 }
 0x13e   :  { %v274_v26 = vrot.slane %v273_v22, 2  ;;  %v261_v27 = vsub.f32 %v1819_v59, %v1834_v23 }
 0x13f   :  { %v269_v28 = vadd.f32 %v268_v24, %v267_v20  ;;  %v264_v29 = vmul.f32 %v260_v25, %v260_v25 }
 0x140   :  { %v275_v30 = vadd.f32 %v274_v26, %v273_v22  ;;  %v265_v31 = vmul.f32 %v261_v27, %v261_v27 }
 0x141   :  { %v270_v32 = vrot.slane %v269_v28, 1  ;;  %v278_v33 = vrot.slane %v264_v29, 4 }
 0x142   :  { %v276_v34 = vrot.slane %v275_v30, 1  ;;  %v284_v35 = vrot.slane %v265_v31, 4 }
 0x143   :  { %v271_v36 = vadd.f32 %v270_v32, %v269_v28  ;;  %v279_v37 = vadd.f32 %v278_v33, %v264_v29 }
 0x144   :  { %v277_v38 = vadd.f32 %v276_v34, %v275_v30  ;;  %v285_v39 = vadd.f32 %v284_v35, %v265_v31 }
 0x145   :  { %v290_v40 = vmul.f32 0.125, %v271_v36  ;;  %v280_v41 = vrot.slane %v279_v37, 2 }
 0x146   :  { %v291_v42 = vmul.f32 0.125, %v277_v38  ;;  %v286_v43 = vrot.slane %v285_v39, 2 }
 0x147   :  { %v294_v45 = vadd.f32 1e-05, %v290_v40  ;;  %v281_v47 = vadd.f32 %v280_v41, %v279_v37 }
 0x148   :  { %v295_v48 = vadd.f32 1e-05, %v291_v42  ;;  %v287_v49 = vadd.f32 %v286_v43, %v285_v39 }
 0x149   :  { %1565 = vrsqrt.f32 %v294_v45  ;;  %v282_v50 = vrot.slane %v281_v47, 1 }
 0x14a   :  { %1567 = vrsqrt.f32 %v295_v48  ;;  %v288_v51 = vrot.slane %v287_v49, 1 }
 0x14b   :  { %v283_v52 = vadd.f32 %v282_v50, %v281_v47  ;;  %v1469_v50 = vld [vmem:[#allocation8 + $0x100] ss:$8 sps:$4 sm:$0xff]  }
 0x14c   :  { %v289_v53 = vadd.f32 %v288_v51, %v287_v49 }
 0x14d   :  { %v292_v54 = vmul.f32 0.125, %v283_v52 }
 0x14e   :  { %v293_v55 = vmul.f32 0.125, %v289_v53  ;;  %v1474_v53 = vld [vmem:[#allocation8 + $0x114] ss:$8 sps:$4 sm:$0xff]  }
 0x14f   :  { %v296_v57 = vadd.f32 1e-05, %v292_v54 }
 0x150   :  { %v297_v58 = vadd.f32 1e-05, %v293_v55  ;;  %v1472_v55 = vld [vmem:[#allocation8 + $0x110] ss:$8 sps:$4 sm:$0xff]  }
 0x151   :  { %1569 = vrsqrt.f32 %v296_v57  ;;  %v1477_v57 = vld [vmem:[#allocation8 + $0x124] ss:$8 sps:$4 sm:$0xff]  }
 0x152   :  { %1571 = vrsqrt.f32 %v297_v58  ;;  %v1475_v58 = vld [vmem:[#allocation8 + $0x120] ss:$8 sps:$4 sm:$0xff]  }
 0x153   :  { %v1566_v60 = vpop.eup %1565 }
 0x154   :  { %v1568_v0 = vpop.eup %1567 }
 0x155   :  { %v306_v1 = vcombine.low %v1566_v60, %v1568_v0  ;;  %v1480_v60 = vld [vmem:[#allocation8 + $0x134] ss:$8 sps:$4 sm:$0xff]  }
 0x156   :  { %v1486_v0 = vld [vmem:[#allocation8 + $0x154] ss:$8 sps:$4 sm:$0xff]  }
 0x157   :  { %v314_v10 = vrot.slane %v306_v1, %v1840_v7  ;;  %v1484_v1 = vld [vmem:[#allocation8 + $0x150] ss:$8 sps:$4 sm:$0xff]  }
 0x15b   :  { %v1570_v5 = vpop.eup %1569 }
 0x15c   :  { %v1572_v8 = vpop.eup %1571 }
 0x15d   :  { %v307_v9 = vcombine.low %v1570_v5, %v1572_v8  ;;  %v1492_v5 = vld [vmem:[#allocation8 + $0x174] ss:$8 sps:$4 sm:$0xff]   ;;  %v1490_v8 = vld [vmem:[#allocation8 + $0x170] ss:$8 sps:$4 sm:$0xff]  }
 0x15f   :  { %v321_v11 = vrot.slane %v307_v9, %v1840_v7  ;;  %v1495_v9 = vld [vmem:[#allocation8 + $0x184] ss:$8 sps:$4 sm:$0xff]  }
 0x161   :  { %v322_v12 = vcombine.low %v314_v10, %v321_v11  ;;  %v1493_v10 = vld [vmem:[#allocation8 + $0x180] ss:$8 sps:$4 sm:$0xff]   ;;  %v1498_v11 = vld [vmem:[#allocation8 + $0x194] ss:$8 sps:$4 sm:$0xff]  }
 0x163   :  { %v329_v15 = vrot.slane %v322_v12, %v1840_v7  ;;  %v1496_v12 = vld [vmem:[#allocation8 + $0x190] ss:$8 sps:$4 sm:$0xff]  }
 0x165   :  { %v331_v19 = vmul.f32 %v329_v15, %v227_v13  ;;  %v1501_v13 = vld [vmem:[#allocation8 + $0x1a4] ss:$8 sps:$4 sm:$0xff]   ;;  %v1499_v15 = vld [vmem:[#allocation8 + $0x1a0] ss:$8 sps:$4 sm:$0xff]  }
 0x167   :  { %v336_v20 = vrot.slane %v331_v19, %v1847_v14  ;;  %v340_v22 = vrot.slane %v331_v19, %v1850_v16  ;;  %v344_v24 = vrot.slane %v331_v19, %v343_v17  ;;  %v348_v25 = vrot.slane %v331_v19, %v347_v18  ;;  %v1507_v19 = vld [vmem:[#allocation8 + $0x1c4] ss:$8 sps:$4 sm:$0xff]  }
 0x169   :  { %v353_v26 = vmul.f32 %v336_v20, %v1824_v4  ;;  %v354_v27 = vmul.f32 %v340_v22, %v1826_v6  ;;  %v355_v28 = vmul.f32 %v344_v24, %v1832_v21  ;;  %v356_v29 = vmul.f32 %v348_v25, %v1834_v23  ;;  %v228_v6 = vld [vmem:[%s1909_s3] sm:$0xf] }
 0x16a   :  { %v390_v30 = vmul.f32 %v348_v25, %v1819_v59  ;;  %v388_v31 = vmul.f32 %v340_v22, %v1811_v46  ;;  %v387_v32 = vmul.f32 %v336_v20, %v1808_v44  ;;  %v389_v33 = vmul.f32 %v344_v24, %v1816_v56  ;;  %v1505_v20 = vld [vmem:[#allocation8 + $0x1c0] ss:$8 sps:$4 sm:$0xff]   ;;  %v1510_v22 = vld [vmem:[#allocation8 + $0x1d4] ss:$8 sps:$4 sm:$0xff]   ;;  %v1508_v24 = vld [vmem:[#allocation8 + $0x1d0] ss:$8 sps:$4 sm:$0xff]  }
 0x16b   :  { %v361_v34 = vcombine.low %v353_v26, %v354_v27  ;;  %v362_v35 = vcombine.low %v355_v28, %v356_v29  ;;  %v1513_v25 = vld [vmem:[#allocation8 + $0x1e4] ss:$8 sps:$4 sm:$0xff]   ;;  %v1511_v26 = vld [vmem:[#allocation8 + $0x1e0] ss:$8 sps:$4 sm:$0xff]   ;;  %v1516_v27 = vld [vmem:[#allocation8 + $0x1f4] ss:$8 sps:$4 sm:$0xff]  }
 0x16c   :  { %v1514_v29 = vld [vmem:[#allocation8 + $0x1f0] ss:$8 sps:$4 sm:$0xff]  }
 0x16d   :  { %v369_v36 = vrot.slane %v361_v34, %v1840_v7  ;;  %v376_v4 = vrot.slane %v362_v35, %v1840_v7  ;;  %v1522_v34 = vld [vmem:[#allocation9 + $0x14] ss:$8 sps:$4 sm:$0xff]   ;;  %v1520_v35 = vld [vmem:[#allocation9 + $0x10] ss:$8 sps:$4 sm:$0xff]  }
 0x16f   :  { %v377_v37 = vcombine.low %v369_v36, %v376_v4  ;;  %v1525_v36 = vld [vmem:[#allocation9 + $0x24] ss:$8 sps:$4 sm:$0xff]   ;;  %v1523_v4 = vld [vmem:[#allocation9 + $0x20] ss:$8 sps:$4 sm:$0xff]  }
 0x171   :  { %v384_v21 = vrot.slane %v377_v37, %v1840_v7  ;;  %v1528_v37 = vld [vmem:[#allocation9 + $0x34] ss:$8 sps:$4 sm:$0xff]  }
 0x173   :  { %v386_v59 = vsub.f32 %v228_v6, %v384_v21  ;;  %v1526_v6 = vld [vmem:[#allocation9 + $0x30] ss:$8 sps:$4 sm:$0xff]   ;;  %v1531_v21 = vld [vmem:[#allocation9 + $0x44] ss:$8 sps:$4 sm:$0xff]  }
 0x175   :  { %v407_v23 = vrot.slane %v386_v59, %v347_v18  ;;  %v399_v46 = vrot.slane %v386_v59, %v1850_v16  ;;  %v395_v44 = vrot.slane %v386_v59, %v1847_v14  ;;  %v403_v56 = vrot.slane %v386_v59, %v343_v17  ;;  %v1504_v17 = vld [vmem:[#allocation8 + $0x1b4] ss:$8 sps:$4 sm:$0xff]   ;;  %v1502_v18 = vld [vmem:[#allocation8 + $0x1b0] ss:$8 sps:$4 sm:$0xff]   ;;  %v1529_v59 = vld [vmem:[#allocation9 + $0x40] ss:$8 sps:$4 sm:$0xff]  }
 0x177   :  { %v415_v38 = vadd.f32 %v407_v23, %v390_v30  ;;  %v413_v39 = vadd.f32 %v399_v46, %v388_v31  ;;  %v412_v40 = vadd.f32 %v395_v44, %v387_v32  ;;  %v1870_v41 = vadd.f32 %v403_v56, %v389_v33  ;;  %v1519_v32 = vld [vmem:[#allocation9 + $0x4] ss:$8 sps:$4 sm:$0xff]   ;;  %v1517_v33 = vld [vmem:[#allocation9] ss:$8 sps:$4 sm:$0xff]   ;;  %v1534_v23 = vld [vmem:[#allocation9 + $0x54] ss:$8 sps:$4 sm:$0xff]  }
 0x178   :  { %1224 = vmatprep.subr.bf16.mxu1 %v1519_v32  ;;  %v1532_v46 = vld [vmem:[#allocation9 + $0x50] ss:$8 sps:$4 sm:$0xff]   ;;  %v1537_v44 = vld [vmem:[#allocation9 + $0x64] ss:$8 sps:$4 sm:$0xff]   ;;  %v1535_v56 = vld [vmem:[#allocation9 + $0x60] ss:$8 sps:$4 sm:$0xff]  }
 0x179   :  { %vm417_vm1 = vcmp.gt.f32.partialorder %v413_v39, 0.0  ;;  %v421_v42 = vmul.f32 0.2, %v413_v39  ;;  %vm416_vm2 = vcmp.gt.f32.partialorder %v412_v40, 0.0  ;;  %v420_v43 = vmul.f32 0.2, %v412_v40  ;;  %1225 = vmatpush1.bf16.msra.mxu1 %v1517_v33 }
 0x17a   :  { %vm419_vm3 = vcmp.gt.f32.partialorder %v415_v38, 0.0  ;;  %v423_v45 = vmul.f32 0.2, %v415_v38  ;;  %v422_v28 = vmul.f32 0.2, %v1870_v41  ;;  %vm418_vm4 = vcmp.gt.f32.partialorder %v1870_v41, 0.0  ;;  %1226 = vmatprep.subr.bf16.mxu1 %v1522_v34 }
 0x17b   :  { %v425_v47 = vsel %vm417_vm1, %v413_v39, %v421_v42  ;;  %v424_v48 = vsel %vm416_vm2, %v412_v40, %v420_v43  ;;  %v1538_v39 = vld [vmem:[#allocation9 + $0x70] ss:$8 sps:$4 sm:$0xff]   ;;  %v1543_v40 = vld [vmem:[#allocation9 + $0x84] ss:$8 sps:$4 sm:$0xff]   ;;  %v1546_v42 = vld [vmem:[#allocation9 + $0x94] ss:$8 sps:$4 sm:$0xff]  }
 0x17c   :  { %v429_v49 = vpack.c.bf16 %v425_v47, %v425_v47  ;;  %v428_v51 = vpack.c.bf16 %v424_v48, %v424_v48  ;;  %v427_v52 = vsel %vm419_vm3, %v415_v38, %v423_v45  ;;  %v426_v30 = vsel %vm418_vm4, %v1870_v41, %v422_v28  ;;  %v1540_v38 = vld [vmem:[#allocation9 + $0x74] ss:$8 sps:$4 sm:$0xff]   ;;  %v1541_v41 = vld [vmem:[#allocation9 + $0x80] ss:$8 sps:$4 sm:$0xff]   ;;  %v1544_v43 = vld [vmem:[#allocation9 + $0x90] ss:$8 sps:$4 sm:$0xff]  }
 0x17d   :  { %v431_v54 = vpack.c.bf16 %v427_v52, %v427_v52  ;;  %v430_v31 = vpack.c.bf16 %v426_v30, %v426_v30  ;;  %1227 = vmatpush1.bf16.msra.mxu1 %v1520_v35  ;;  %v1549_v45 = vld [vmem:[#allocation9 + $0xa4] ss:$8 sps:$4 sm:$0xff]   ;;  %v1547_v47 = vld [vmem:[#allocation9 + $0xa0] ss:$8 sps:$4 sm:$0xff]   ;;  %v1552_v48 = vld [vmem:[#allocation9 + $0xb4] ss:$8 sps:$4 sm:$0xff]  }
 0x17e   :  { %848 = vmatprep.mubr.bf16.mxu0 %v429_v49  ;;  %1228 = vmatprep.subr.bf16.mxu1 %v1525_v36  ;;  %v1550_v49 = vld [vmem:[#allocation9 + $0xb0] ss:$8 sps:$4 sm:$0xff]   ;;  %v1558_v52 = vld [vmem:[#allocation9 + $0xd4] ss:$8 sps:$4 sm:$0xff]  }
 0x17f   :  { %849 = vmatmul.mubr.bf16.vlgmr.msra.gmra.mrb[0].mxu0 %v428_v51  ;;  %v1553_v51 = vld [vmem:[#allocation9 + $0xc0] ss:$8 sps:$4 sm:$0xff]  }
 0x180   :  { %858 = vmatpush1.bf16.msra.mxu0 %v1469_v50  ;;  %889 = vmatprep.mubr.bf16.mxu0 %v431_v54  ;;  %v1555_v50 = vld [vmem:[#allocation9 + $0xc4] ss:$8 sps:$4 sm:$0xff]  }
 0x181   :  { %859 = vmatprep.subr.bf16.mxu0 %v1474_v53  ;;  %1229 = vmatpush1.bf16.msra.mxu1 %v1523_v4  ;;  %v1556_v53 = vld [vmem:[#allocation9 + $0xd0] ss:$8 sps:$4 sm:$0xff]   ;;  %v1561_v54 = vld [vmem:[#allocation9 + $0xe4] ss:$8 sps:$4 sm:$0xff]  }
 0x182   :  { %1230 = vmatprep.subr.bf16.mxu1 %v1528_v37 }
 0x184   :  { %860 = vmatpush1.bf16.msra.mxu0 %v1472_v55  ;;  %v1559_v55 = vld [vmem:[#allocation9 + $0xe0] ss:$8 sps:$4 sm:$0xff]  }
 0x185   :  { %861 = vmatprep.subr.bf16.mxu0 %v1477_v57  ;;  %1231 = vmatpush1.bf16.msra.mxu1 %v1526_v6  ;;  %v1564_v57 = vld [vmem:[#allocation9 + $0xf4] ss:$8 sps:$4 sm:$0xff]  }
 0x186   :  { %1232 = vmatprep.subr.bf16.mxu1 %v1531_v21 }
 0x188   :  { %862 = vmatpush1.bf16.msra.mxu0 %v1475_v58  ;;  %v1562_v58 = vld [vmem:[#allocation9 + $0xf0] ss:$8 sps:$4 sm:$0xff]  }
 0x189   :  { %863 = vmatprep.subr.bf16.mxu0 %v1480_v60  ;;  %1233 = vmatpush1.bf16.msra.mxu1 %v1529_v59 }
 0x18a   :  { %1234 = vmatprep.subr.bf16.mxu1 %v1534_v23 }
 0x18c   :  { %864 = vmatpush1.bf16.msra.mxu0 %v1478_v61 }
 0x18d   :  { %865 = vmatprep.subr.bf16.mxu0 %v1483_v62  ;;  %1235 = vmatpush1.bf16.msra.mxu1 %v1532_v46 }
 0x18e   :  { %1236 = vmatprep.subr.bf16.mxu1 %v1537_v44 }
 0x190   :  { %866 = vmatpush1.bf16.msra.mxu0 %v1481_v63 }
 0x191   :  { %867 = vmatprep.subr.bf16.mxu0 %v1486_v0  ;;  %1237 = vmatpush1.bf16.msra.mxu1 %v1535_v56  ;;  %v898_v56 = vld [vmem:[%s1911_s5] sm:$0x3] }
 0x192   :  { %1238 = vmatprep.subr.bf16.mxu1 %v1540_v38 }
 0x194   :  { %868 = vmatpush1.bf16.msra.mxu0 %v1484_v1 }
 0x195   :  { %869 = vmatprep.subr.bf16.mxu0 %v1489_v2  ;;  %1239 = vmatpush1.bf16.msra.mxu1 %v1538_v39 }
 0x196   :  { %1240 = vmatprep.subr.bf16.mxu1 %v1543_v40 }
 0x198   :  { %870 = vmatpush1.bf16.msra.mxu0 %v1487_v3 }
 0x199   :  { %871 = vmatprep.subr.bf16.mxu0 %v1492_v5  ;;  %1241 = vmatpush1.bf16.msra.mxu1 %v1541_v41 }
 0x19a   :  { %1242 = vmatprep.subr.bf16.mxu1 %v1546_v42 }
 0x19c   :  { %872 = vmatpush1.bf16.msra.mxu0 %v1490_v8 }
 0x19d   :  { %873 = vmatprep.subr.bf16.mxu0 %v1495_v9  ;;  %1243 = vmatpush1.bf16.msra.mxu1 %v1544_v43 }
 0x19e   :  { %1244 = vmatprep.subr.bf16.mxu1 %v1549_v45 }
 0x1a0   :  { %874 = vmatpush1.bf16.msra.mxu0 %v1493_v10 }
 0x1a1   :  { %875 = vmatprep.subr.bf16.mxu0 %v1498_v11  ;;  %1245 = vmatpush1.bf16.msra.mxu1 %v1547_v47 }
 0x1a2   :  { %1246 = vmatprep.subr.bf16.mxu1 %v1552_v48 }
 0x1a4   :  { %876 = vmatpush1.bf16.msra.mxu0 %v1496_v12 }
 0x1a5   :  { %877 = vmatprep.subr.bf16.mxu0 %v1501_v13  ;;  %1247 = vmatpush1.bf16.msra.mxu1 %v1550_v49 }
 0x1a6   :  { %1248 = vmatprep.subr.bf16.mxu1 %v1555_v50  ;;  %v899_v50 = vld [vmem:[%s1912_s6] sm:$0x3] }
 0x1a8   :  { %878 = vmatpush1.bf16.msra.mxu0 %v1499_v15 }
 0x1a9   :  { %879 = vmatprep.subr.bf16.mxu0 %v1504_v17  ;;  %1249 = vmatpush1.bf16.msra.mxu1 %v1553_v51 }
 0x1aa   :  { %1250 = vmatprep.subr.bf16.mxu1 %v1558_v52 }
 0x1ac   :  { %880 = vmatpush1.bf16.msra.mxu0 %v1502_v18 }
 0x1ad   :  { %881 = vmatprep.subr.bf16.mxu0 %v1507_v19  ;;  %1251 = vmatpush1.bf16.msra.mxu1 %v1556_v53 }
 0x1ae   :  { %1252 = vmatprep.subr.bf16.mxu1 %v1561_v54 }
 0x1b0   :  { %882 = vmatpush1.bf16.msra.mxu0 %v1505_v20 }
 0x1b1   :  { %883 = vmatprep.subr.bf16.mxu0 %v1510_v22  ;;  %1253 = vmatpush1.bf16.msra.mxu1 %v1559_v55 }
 0x1b2   :  { %1254 = vmatprep.subr.bf16.mxu1 %v1564_v57 }
 0x1b4   :  { %884 = vmatpush1.bf16.msra.mxu0 %v1508_v24 }
 0x1b5   :  { %885 = vmatprep.subr.bf16.mxu0 %v1513_v25  ;;  %1255 = vmatpush1.bf16.msra.mxu1 %v1562_v58 }
 0x1b8   :  { %886 = vmatpush1.bf16.msra.mxu0 %v1511_v26 }
 0x1b9   :  { %887 = vmatprep.subr.bf16.mxu0 %v1516_v27 }
 0x1bc   :  { %888 = vmatpush1.bf16.msra.mxu0 %v1514_v29 }
 0x1bf   :  { %890 = vmatmul.mubr.bf16.vlgmr.msra.gmra.mrb[0].mxu0 %v430_v31 }
 0x292   :  { %v891_v60 = vpop.f32.mrb[0].mxu0 }
 0x293   :  { %v900_v61 = vrot.slane %v891_v60, 4  ;;  %v893_v62 = vpop.f32.mrb[1].mxu0 }
 0x294   :  { %v906_v63 = vrot.slane %v893_v62, 4  ;;  %v895_v0 = vpop.f32.mrb[2].mxu0 }
 0x295   :  { %v901_v1 = vadd.f32 %v900_v61, %v891_v60  ;;  %v896_v2 = vpop.f32.mrb[3].mxu0 }
 0x296   :  { %v907_v3 = vadd.f32 %v906_v63, %v893_v62 }
 0x297   :  { %v902_v5 = vrot.slane %v901_v1, 2 }
 0x298   :  { %v908_v8 = vrot.slane %v907_v3, 2 }
 0x299   :  { %v903_v9 = vadd.f32 %v902_v5, %v901_v1 }
 0x29a   :  { %v909_v10 = vadd.f32 %v908_v8, %v907_v3 }
 0x29b   :  { %v904_v11 = vrot.slane %v903_v9, 1 }
 0x29c   :  { %v910_v12 = vrot.slane %v909_v10, 1 }
 0x29d   :  { %v905_v13 = vadd.f32 %v904_v11, %v903_v9 }
 0x29e   :  { %v911_v15 = vadd.f32 %v910_v12, %v909_v10 }
 0x29f   :  { %v912_v17 = vmul.f32 0.125, %v905_v13 }
 0x2a0   :  { %v913_v18 = vmul.f32 0.125, %v911_v15 }
 0x2a1   :  { %v914_v19 = vsub.f32 %v891_v60, %v912_v17 }
 0x2a2   :  { %v915_v20 = vsub.f32 %v893_v62, %v913_v18 }
 0x2a3   :  { %v916_v22 = vmul.f32 %v914_v19, %v914_v19 }
 0x2a4   :  { %v917_v24 = vmul.f32 %v915_v20, %v915_v20 }
 0x2a5   :  { %v918_v25 = vrot.slane %v916_v22, 4 }
 0x2a6   :  { %v924_v26 = vrot.slane %v917_v24, 4 }
 0x2a7   :  { %v919_v27 = vadd.f32 %v918_v25, %v916_v22 }
 0x2a8   :  { %v925_v28 = vadd.f32 %v924_v26, %v917_v24 }
 0x2a9   :  { %v920_v29 = vrot.slane %v919_v27, 2 }
 0x2aa   :  { %v926_v30 = vrot.slane %v925_v28, 2 }
 0x2ab   :  { %v921_v31 = vadd.f32 %v920_v29, %v919_v27 }
 0x2ac   :  { %v927_v32 = vadd.f32 %v926_v30, %v925_v28 }
 0x2ad   :  { %v922_v33 = vrot.slane %v921_v31, 1 }
 0x2ae   :  { %v928_v34 = vrot.slane %v927_v32, 1 }
 0x2af   :  { %v923_v35 = vadd.f32 %v922_v33, %v921_v31 }
 0x2b0   :  { %v929_v36 = vadd.f32 %v928_v34, %v927_v32 }
 0x2b1   :  { %v930_v4 = vmul.f32 0.125, %v923_v35 }
 0x2b2   :  { %v931_v37 = vmul.f32 0.125, %v929_v36 }
 0x2b3   :  { %v932_v6 = vadd.f32 1e-05, %v930_v4 }
 0x2b4   :  { %v933_v21 = vadd.f32 1e-05, %v931_v37 }
 0x2b5   :  { %1573 = vrsqrt.f32 %v932_v6 }
 0x2b6   :  { %1575 = vrsqrt.f32 %v933_v21 }
 0x2bf   :  { %v1574_v59 = vpop.eup %1573 }
 0x2c0   :  { %v1576_v23 = vpop.eup %1575 }
 0x2c1   :  { %v938_v46 = vcombine.low %v1574_v59, %v1576_v23 }
 0x2c3   :  { %v945_v44 = vrot.slane %v938_v46, %v1840_v7 }
 0x2c5   :  { %v952_v38 = vrot.slane %v945_v44, %v1840_v7 }
 0x2c7   :  { %v954_v39 = vmul.f32 %v952_v38, %v898_v56 }
 0x2c9   :  { %v959_v40 = vrot.slane %v954_v39, %v1847_v14  ;;  %v963_v41 = vrot.slane %v954_v39, %v1850_v16 }
 0x2cb   :  { %v966_v42 = vmul.f32 %v959_v40, %v912_v17  ;;  %v967_v43 = vmul.f32 %v963_v41, %v913_v18  ;;  %v987_v45 = vmul.f32 %v959_v40, %v891_v60  ;;  %v988_v47 = vmul.f32 %v963_v41, %v893_v62 }
 0x2cd   :  { %v970_v48 = vcombine.low %v966_v42, %v967_v43 }
 0x2cf   :  { %v977_v49 = vrot.slane %v970_v48, %v1840_v7 }
 0x2d1   :  { %v984_v51 = vrot.slane %v977_v49, %v1840_v7  ;;  %v1052_v7 = vld [vmem:[%s1914_s8] sm:$0x3]  ;;  %s1669_s8 = scalar_lea.vmem %s1276_s21, 256 }
 0x2d2   :  { %v1057_v1 = vrot.slane %v1052_v7, %v1847_v14  ;;  %v1061_v2 = vrot.slane %v1052_v7, %v1850_v16  ;;  %p1670_p4 = scmp.ne.s32.totalorder %s1276_s21, %s1669_s8  ;;  %p1675_p6 = scmp.lt.s32.totalorder %s1669_s8, %s1669_s8 }
 0x2d3   :  { %v986_v52 = vsub.f32 %v899_v50, %v984_v51 }
 0x2d4   :  { %p1676_p7 = por %p1675_p6, %p1674_p5 }
 0x2d5   :  { %v993_v53 = vrot.slane %v986_v52, %v1847_v14  ;;  %v997_v54 = vrot.slane %v986_v52, %v1850_v16 }
 0x2d6   :  { %p1677_p8 = pnand %p1676_p7, %p1670_p4 }
 0x2d7   :  { %v1001_v55 = vadd.f32 %v997_v54, %v988_v47  ;;  %v1000_v57 = vadd.f32 %v993_v53, %v987_v45 }
 0x2d9   :  { %vm1003_vm5 = vcmp.gt.f32.partialorder %v1001_v55, 0.0  ;;  %v1005_v58 = vmul.f32 0.2, %v1001_v55  ;;  %vm1002_vm6 = vcmp.gt.f32.partialorder %v1000_v57, 0.0  ;;  %v1004_v60 = vmul.f32 0.2, %v1000_v57 }
 0x2db   :  { %v1007_v61 = vsel %vm1003_vm5, %v1001_v55, %v1005_v58  ;;  %v1006_v62 = vsel %vm1002_vm6, %v1000_v57, %v1004_v60 }
 0x2dc   :  { %v1019_v63 = vpack.c.bf16 %v1007_v61, %v1007_v61  ;;  %v1018_v0 = vpack.c.bf16 %v1006_v62, %v1006_v62 }
 0x2de   :  { %1256 = vmatprep.mubr.bf16.mxu1 %v1019_v63 }
 0x2df   :  { %1257 = vmatmul.mubr.bf16.vlgmr.msra.gmra.mrb[8].mxu1 %v1018_v0 }
 0x3b2   :  { %v1258_v3 = vpop.f32.mrb[8].mxu1 }
 0x3b3   :  { %v1259_v5 = vadd.f32 %v1258_v3, %v1057_v1  ;;  %v1260_v8 = vpop.f32.mrb[9].mxu1 }
 0x3b4   :  { %v1261_v9 = vadd.f32 %v1260_v8, %v1061_v2  ;;  %v1262_v10 = vpop.f32.mrb[10].mxu1 }
 0x3b5   :  { %1577 = vtanh.f32 %v1259_v5  ;;  %v1263_v11 = vpop.f32.mrb[11].mxu1 }
 0x3b6   :  { %1579 = vtanh.f32 %v1261_v9 }
 0x3bf   :  { %v1578_v12 = vpop.eup %1577 }
 0x3c0   :  { %v1580_v13 = vpop.eup %1579  ;;  %1267 = vst [vmem:[#allocation11] sm:$0xff] %v1578_v12 }
 0x3c1   :  { %1268 = vst [vmem:[#allocation11 + $0x8] sm:$0xff] %v1580_v13 }
 0x3c2   :  { %1680 = shalt.err (!%p1677_p8)
}
 0x3c3   :  { %s1681_s23 = scalar_lea.hbm %s1915_s9, 256 }
 0x3c4   :  { %p1682_p9 = scmp.ne.s32.totalorder %s1915_s9, %s1681_s23  ;;  %p1685_p10 = scmp.lt.u32.totalorder %s1681_s23, %s1915_s9 }
 0x3c6   :  { %p1687_p11 = pnand %p1685_p10, %p1682_p9 }
 0x3c8   :  { %1690 = shalt.err (!%p1687_p11)
}
 0x3c9   :  { %1278 = dma.vmem_to_hbm [thread:$0]  %s1276_s21, 256, %s1915_s9, [#allocation5]  }
 0x3ca   :  { %1697 = dma.done.wait [#allocation5], 256  }
 0x3cb   :  { %1698 = vsyncadd [#allocation5], 4294967040 }
 0x3cc   :  { %1282 = vsyncpa [#allocation4], 1 }
 0x3cd   :  { %1283 = vsyncpa [#allocation7], 1 }
 0x3ce   :  { %1284 = vsyncpa [#allocation10], 1 }
 0x3cf   :  { %1285 = vsyncpa [#allocation5], 1 }

</bundles_post_ra>
